<compile_context>
chip_gen: v6e
topology: v6e:2x2x1
jax: 0.10.0
libtpu: 0.0.40
codegen_flags: <defaults>
</compile_context>

<pallas_src>
import jax
import jax.numpy as jnp
from jax.experimental import pallas as pl
from jax.experimental.pallas import tpu as pltpu


def _round_up(a, b):
    return ((a + b - 1) // b) * b


def _hyperfc_kernel(x_ref, w_ref, b_ref, o_ref):
    # x_ref: (1, Cin, TM)  w_ref: (1, Cout, Cin)  b_ref: (1, Cout, 1)  o_ref: (1, Cout, TM)
    x = x_ref[0]                 # (Cin, TM)  -- M on lanes
    w = w_ref[0]                 # (Cout, Cin) -- consumed directly by MXU, no .T
    b = b_ref[0]                 # (Cout, 1)   -- f32
    y = jnp.dot(w, x, preferred_element_type=jnp.float32)   # (Cout, TM), f32 acc
    o_ref[0] = (y + b).astype(o_ref.dtype)                   # f32 epilogue, cast on store


def hyperfc_pallas(x, w_vec, in_channels, out_channels, *,
                   compute_dtype=None, max_tile_m=2048):
    """x: (B, S1, S2, S3, Cin), w_vec: (B, Cout*Cin + Cout) -> (B, S1, S2, S3, Cout)."""
    B, S1, S2, S3, Cin = x.shape
    assert Cin == in_channels
    Cout = out_channels
    M = S1 * S2 * S3
    out_dtype = x.dtype

    # ---- glue: split hyper-parameter vector (matches torch .view semantics) ----
    w_mat = w_vec[..., : Cout * Cin].reshape(B, Cout, Cin)
    bias = w_vec[..., Cout * Cin:].reshape(B, Cout, 1).astype(jnp.float32)

    # Optional bf16 inputs (recommended on v6e/v7x: op is HBM-bandwidth-bound).
    # Accumulation stays f32 and the bias add stays f32 (v5e-safe epilogue).
    if compute_dtype is not None:
        x = x.astype(compute_dtype)
        w_mat = w_mat.astype(compute_dtype)

    # ---- lane-dense layout: put the large M dimension on lanes ----
    x_t = jnp.transpose(x.reshape(B, M, Cin), (0, 2, 1))      # (B, Cin, M)

    # ---- tile M; keep double-buffered tiles well inside scoped VMEM on all gens ----
    in_bytes = jnp.dtype(x_t.dtype).itemsize
    out_bytes = jnp.dtype(out_dtype).itemsize
    vmem_budget = 16 * 1024 * 1024     # streaming buffers only; headroom under 32 MiB scoped
    tm_cap = vmem_budget // (2 * (Cin * in_bytes + Cout * out_bytes))
    TM = min(max_tile_m, tm_cap, _round_up(M, 128))
    TM = max(128, (TM // 128) * 128)   # multiple of 128 lanes
    M_pad = _round_up(M, TM)
    if M_pad != M:
        x_t = jnp.pad(x_t, ((0, 0), (0, 0), (0, M_pad - M)))
    n_m = M_pad // TM

    cost = pl.CostEstimate(
        flops=2 * B * M_pad * Cin * Cout,
        transcendentals=0,
        bytes_accessed=(x_t.size * in_bytes + w_mat.size * in_bytes
                        + bias.size * 4 + B * Cout * M_pad * out_bytes),
    )

    out_t = pl.pallas_call(
        _hyperfc_kernel,
        out_shape=jax.ShapeDtypeStruct((B, Cout, M_pad), out_dtype),
        grid_spec=pltpu.PrefetchScalarGridSpec(
            num_scalar_prefetch=0,
            grid=(B, n_m),
            in_specs=[
                pl.BlockSpec((1, Cin, TM), lambda b, m: (b, 0, m)),
                # weight / bias block index is independent of m -> stays resident
                # in VMEM across all M tiles of a batch (no re-DMA).
                pl.BlockSpec((1, Cout, Cin), lambda b, m: (b, 0, 0)),
                pl.BlockSpec((1, Cout, 1), lambda b, m: (b, 0, 0)),
            ],
            out_specs=pl.BlockSpec((1, Cout, TM), lambda b, m: (b, 0, m)),
        ),
        compiler_params=pltpu.CompilerParams(
            dimension_semantics=("parallel", "parallel"),
            vmem_limit_bytes=32 * 1024 * 1024,
        ),
        cost_estimate=cost,
    )(x_t, w_mat, bias)

    out = jnp.transpose(out_t[:, :, :M], (0, 2, 1))           # (B, M, Cout)
    return out.reshape(B, S1, S2, S3, Cout)


if __name__ == "__main__":
    # Small deterministic shapes consistent with the forward pass.
    B, S1, S2, S3 = 2, 4, 4, 4
    in_channels, out_channels = 4, 8

    key = jax.random.PRNGKey(0)
    kx, kw = jax.random.split(key)
    x = jax.random.normal(kx, (B, S1, S2, S3, in_channels), dtype=jnp.float32)
    # Hyper-network output vector: per-batch flattened (Cout*Cin) weights + Cout bias.
    w_vec = jax.random.normal(
        kw, (B, out_channels * in_channels + out_channels), dtype=jnp.float32
    )

    # Pure-JAX reference (same math as the torch einsum + bias broadcast).
    w_mat = w_vec[..., : out_channels * in_channels].reshape(B, out_channels, in_channels)
    bias = w_vec[..., out_channels * in_channels:].reshape(B, out_channels)
    ref = jnp.einsum("a...c,adc->a...d", x, w_mat) + bias[:, None, None, None, :]

    # f32 path: exact semantics of the torch module.
    out = jax.block_until_ready(hyperfc_pallas(x, w_vec, in_channels, out_channels))
    assert out.shape == (B, S1, S2, S3, out_channels)
    assert jnp.allclose(out, ref, atol=1e-5, rtol=1e-5)

    # bf16-input path (bandwidth optimization for v6e/v7x); f32 accumulation, looser tol.
    out_bf16 = jax.block_until_ready(
        hyperfc_pallas(x, w_vec, in_channels, out_channels, compute_dtype=jnp.bfloat16)
    )
    assert jnp.allclose(out_bf16, ref, atol=1e-1, rtol=1e-1)

    print("KERNEL_OK")
</pallas_src>

<mosaic_0001>
module attributes {stable_mosaic.version = 11 : i64} {
  func.func @_hyperfc_kernel(%arg0: i32, %arg1: i32, %arg2: memref<1x4x128xf32, #tpu.memory_space<vmem>>, %arg3: memref<1x8x4xf32, #tpu.memory_space<vmem>>, %arg4: memref<1x8x1xf32, #tpu.memory_space<vmem>>, %arg5: memref<1x8x128xf32, #tpu.memory_space<vmem>>) attributes {dimension_semantics = [#tpu.dimension_semantics<parallel>, #tpu.dimension_semantics<parallel>], iteration_bounds = array<i64: 2, 1>, scalar_prefetch = 0 : i64, scratch_operands = 0 : i64, tpu.core_type = #tpu.core_type<tc>, window_params = [{transform_indices = @transform_0, window_bounds = array<i64: 1, 4, 128>}, {transform_indices = @transform_1, window_bounds = array<i64: 1, 8, 4>}, {transform_indices = @transform_2, window_bounds = array<i64: 1, 8, 1>}, {transform_indices = @transform_3, window_bounds = array<i64: 1, 8, 128>}]} {
    %c0 = arith.constant 0 : index
    %c0_0 = arith.constant 0 : index
    %c0_1 = arith.constant 0 : index
    %0 = vector.load %arg2[%c0, %c0_0, %c0_1] : memref<1x4x128xf32, #tpu.memory_space<vmem>>, vector<1x4x128xf32>
    %1 = vector.shape_cast %0 : vector<1x4x128xf32> to vector<4x128xf32>
    %c0_2 = arith.constant 0 : index
    %c0_3 = arith.constant 0 : index
    %c0_4 = arith.constant 0 : index
    %2 = vector.load %arg3[%c0_2, %c0_3, %c0_4] : memref<1x8x4xf32, #tpu.memory_space<vmem>>, vector<1x8x4xf32>
    %3 = vector.shape_cast %2 : vector<1x8x4xf32> to vector<8x4xf32>
    %c0_5 = arith.constant 0 : index
    %c0_6 = arith.constant 0 : index
    %c0_7 = arith.constant 0 : index
    %4 = vector.load %arg4[%c0_5, %c0_6, %c0_7] : memref<1x8x1xf32, #tpu.memory_space<vmem>>, vector<1x8x1xf32>
    %5 = vector.shape_cast %4 : vector<1x8x1xf32> to vector<8x1xf32>
    %cst = arith.constant dense<0.000000e+00> : vector<8x128xf32>
    %6 = tpu.matmul %3, %1, %cst {dimension_numbers = #tpu.dot_dimension_numbers<[1], [0], [0], [1], [0, 0, 1, 1], [], []>} : vector<8x4xf32>, vector<4x128xf32>, vector<8x128xf32> -> vector<8x128xf32>
    %7 = vector.broadcast %5 : vector<8x1xf32> to vector<8x128xf32>
    %8 = arith.addf %6, %7 : vector<8x128xf32>
    %c0_8 = arith.constant 0 : index
    %c0_9 = arith.constant 0 : index
    %c0_10 = arith.constant 0 : index
    %9 = vector.load %arg5[%c0_8, %c0_9, %c0_10] : memref<1x8x128xf32, #tpu.memory_space<vmem>>, vector<1x8x128xf32>
    %10 = vector.shape_cast %9 : vector<1x8x128xf32> to vector<8x128xf32>
    %11 = vector.shape_cast %8 : vector<8x128xf32> to vector<1x8x128xf32>
    tpu.vector_store %arg5[%c0_8, %c0_9, %c0_10], %11 {strides = array<i32>} : memref<1x8x128xf32, #tpu.memory_space<vmem>>, vector<1x8x128xf32>,
    return
  }
  func.func @transform_0(%arg0: i32, %arg1: i32) -> (i32, i32, i32) {
    %c0_i32 = arith.constant 0 : i32
    %c0_i32_0 = arith.constant 0 : i32
    return %arg0, %c0_i32, %arg1 : i32, i32, i32
  }
  func.func @transform_1(%arg0: i32, %arg1: i32) -> (i32, i32, i32) {
    %c0_i32 = arith.constant 0 : i32
    %c0_i32_0 = arith.constant 0 : i32
    %c0_i32_1 = arith.constant 0 : i32
    return %arg0, %c0_i32, %c0_i32_0 : i32, i32, i32
  }
  func.func @transform_2(%arg0: i32, %arg1: i32) -> (i32, i32, i32) {
    %c0_i32 = arith.constant 0 : i32
    %c0_i32_0 = arith.constant 0 : i32
    %c0_i32_1 = arith.constant 0 : i32
    return %arg0, %c0_i32, %c0_i32_0 : i32, i32, i32
  }
  func.func @transform_3(%arg0: i32, %arg1: i32) -> (i32, i32, i32) {
    %c0_i32 = arith.constant 0 : i32
    %c0_i32_0 = arith.constant 0 : i32
    return %arg0, %c0_i32, %arg1 : i32, i32, i32
  }
}

</mosaic_0001>

<bundles_post_ra>
// kernel: tpu_custom_call.1
= control target key start
LH: loop header
LB: loop body
LE: loop exit
PB: predicated region body
PF: predicated region fallthrough
CT: control target
= control target key end

     0   :  { %8 = vsyncpa [#allocation3], 0  ;;  %s716_s0 = inlined_call_operand.vmem [shape: f32[2,4,128], index: 0, kind: input, shape index: {}]   ;;  %s717_s1 = inlined_call_operand.vmem [shape: f32[2,8,4], index: 1, kind: input, shape index: {}]   ;;  %s718_s2 = inlined_call_operand.vmem [shape: f32[2,8,1], index: 2, kind: input, shape index: {}]   ;;  %s719_s3 = inlined_call_operand.hbm [shape: f32[2,8,128], index: 3, kind: output, shape index: {}]  }
   0x1   :  { %10 = vsyncpa [#allocation3 + $0x1], 0  ;;  %s605_s12 = smov 0   ;;  %s607_s13 = smov 0  }
   0x2   :  { %s609_s14 = smov 0   ;;  %s611_s15 = smov 0  }
   0x3   :  { %s613_s16 = smov 0   ;;  %s615_s17 = smov 0  }
   0x4 LB: > { %s422_s18 = sadd.s32 4294967295, %s579_s17   ;;  %s423_s19 = sadd.s32 4294967294, %s579_s17   ;;  %s579_s17 = sphi %s615_s17, %s16_s17   ;;  %s575_s16 = sphi %s613_s16, %s726_s16   ;;  %s571_s15 = sphi %s611_s15, %s725_s15   ;;  %s567_s14 = sphi %s609_s14, %s724_s14   ;;  %s563_s13 = sphi %s607_s13, %s723_s13   ;;  %s559_s12 = sphi %s605_s12, %s722_s12  }
   0x5   : > { %s28_s20 = sadd.s32 1, %s575_s16  ;;  %s117_s21 = sadd.s32 1, %s567_s14 }
   0x6   : > { %p30_p0 = scmp.ge.s32.totalorder %s28_s20, 2  ;;  %p127_p1 = scmp.ne.s32.totalorder %s567_s14, %s563_s13 }
   0x7   : > { %p128_p2 = scmp.eq.s32.totalorder %s422_s18, 1  ;;  %p133_p3 = scmp.ne.s32.totalorder %s563_s13, %s559_s12 }
   0x8   : > { %s728_s20 = smov (%p30_p0, %s28_s20), 0  ;;  %p134_p5 = scmp.eq.s32.totalorder %s423_s19, 1 }
   0x9   : > { %p645_p4 = por %p128_p2, %p127_p1  ;;  %s112_s23 = ssub.s32 %s575_s16, %s728_s20 }
   0xa   : > { %p426_p6 = scmp.ge.s32.totalorder %s579_s17, 1  ;;  %p115_p7 = scmp.eq.s32.totalorder %s112_s23, 0 }
   0xb   : > { %p652_p8 = por %p134_p5, %p133_p3  ;;  %p176_p9 = scmp.lt.s32.totalorder %s579_s17, 3 }
   0xc   : > { %s658_s25 = scalar_select %p115_p7, %s567_s14, %s117_s21  }
   0xd   : > { %p177_p10 = pnand %p426_p6, %p176_p9 }
   0xe   : > { %p210_p11 = scmp.lt.s32.totalorder (!%p177_p10), %s571_s15, 1  ;;  %s207_s11 = sand.u32 (!%p177_p10), 1, %s563_s13  }
   0xf   : > { %180 = sbr.rel (%p177_p10) target bundleno = 234 (0xea), region = 32  ;;  %s427_s18 = sshll.u32 (!%p177_p10), %s207_s11, 3 }
  0x10   : > { %s434_s19 = sshll.u32 (!%p177_p10), %s571_s15, 7  ;;  %s209_s21 = scalar_lea.vmem (!%p177_p10), [#allocation2], %s427_s18 }
  0x11   : > { %s327_s23 = sshll.u32 (!%p177_p10), %s209_s21, 4  ;;  %s676_s29 = scalar_lea.hbm (!%p177_p10), %s719_s3, %s434_s19  ;;  %s328_s23 = int_to_ptr.vmem [resolvable:$true] %s327_s23 }
  0x12   : > { %s503_s30 = scalar_lea.vmem (!%p177_p10), %s328_s23, 128 }
  0x13   : > { %p504_p12 = scmp.ne.s32.totalorder (!%p177_p10), %s328_s23, %s503_s30 }
  0x14   : > { %v581_v0 = vmov 0.0   ;;  %vm582_vm0 = vmmov 0   ;;  %s211_s26 = scalar_select %p210_p11, %s571_s15, 1  ;;  %v583_v1 = vmov 0   ;;  %vm237_vm1 = vcmask 1043456  }
  0x15   : > { %439 = vmatprep.subr.mxu0 %v581_v0  ;;  %441 = vmatprep.mubr.msk.f32.mxu0 %vm582_vm0, %v581_v0  ;;  %vm233_vm2 = vcmask 31744   ;;  %p505_p13 = pnand %p504_p12, %p645_p4 }
  0x16   : > { %502 = vset.pattern.permute.xlu0 %v583_v1  ;;  %s428_s27 = sshll.u32 %s211_s26, 2  ;;  %s429_s28 = sshll.u32 %s211_s26, 3 }
  0x17   : > { %s216_s4 = scalar_lea.vmem %s716_s0, %s428_s27  ;;  %s220_s7 = scalar_lea.vmem %s717_s1, %s429_s28 }
  0x18   : > { %v225_v2 = vld [vmem:[%s216_s4] sm:$0xf]  ;;  %s224_s10 = scalar_lea.vmem %s718_s2, %s429_s28  ;;  %s313_s28 = scalar_lea.sflag [#allocation3], %s207_s11 }
  0x19   : > { %v226_v3 = vld [vmem:[%s220_s7] sm:$0xff]  ;;  %440 = vmatpush3.msk.msra.mxu0 %vm237_vm1, %v225_v2  ;;  %p506_p0 = pneg %p505_p13  ;;  %s584_s4 = smov [#allocation2]  }
  0x1a   : > { %v227_v4 = vld [vmem:[%s224_s10] sm:$0xff]  ;;  %442 = vmatmul.mubr.msk.f32.vlgmr.msra.gmra.mxu0 %vm233_vm2, %v226_v3  ;;  %s507_s15 = sshll.u32 %s584_s4, 4  ;;  %s508_s15 = int_to_ptr.vmem [resolvable:$false] %s507_s15 }
  0x1b   : > { %230 = vperm.xlu0 %502, %v227_v4   ;;  %s509_s5 = scalar_lea.vmem %s508_s15, 256  ;;  %p510_p1 = scmp.lt.s32.totalorder %s328_s23, %s508_s15 }
  0x1c   : > { %p511_p2 = scmp.lt.s32.totalorder %s509_s5, %s503_s30 }
  0x1e   : > { %p512_p3 = por %p511_p2, %p510_p1 }
  0x20   : > { %p513_p5 = pnand %p512_p3, %p506_p0 }
  0x96   : > { %v231_v5 = vpop.permute.xlu0 %230 }
  0xda   : > { %v307_v6 = vpop.f32.mrf.mxu0 }
  0xdb   : > { %v308_v7 = vadd.f32 %v307_v6, %v231_v5 }
  0xdc   : > { %v443_v8 = vpop.f32.mrf.mxu0 }
  0xdd   : > { %311 = vst [vmem:[%s209_s21] sm:$0xff] %v308_v7 }
  0xde   : > { %516 = shalt.err (!%p513_p5)
}
  0xdf   : > { %s517_s6 = scalar_lea.hbm %s676_s29, 128  ;;  %s521_s9 = scalar_lea.hbm %s719_s3, 256 }
  0xe0   : > { %p518_p6 = scmp.ne.s32.totalorder %s676_s29, %s517_s6  ;;  %p522_p10 = scmp.lt.s32.totalorder %s676_s29, %s719_s3 }
  0xe1   : > { %p523_p11 = scmp.lt.s32.totalorder %s521_s9, %s517_s6 }
  0xe2   : > { %p519_p7 = pnand %p518_p6, %p645_p4 }
  0xe3   : > { %p524_p12 = por %p523_p11, %p522_p10 }
  0xe4   : > { %p520_p9 = pneg %p519_p7 }
  0xe6   : > { %p525_p13 = pnand %p524_p12, %p520_p9 }
  0xe8   : > { %528 = shalt.err (!%p525_p13)
}
  0xe9   : > { %444 = dma.vmem_to_hbm [thread:$0]  (%p645_p4), %s328_s23, 128, %s676_s29, %s313_s28  }
  0xea PF: > { %p450_p0 = scmp.ge.s32.totalorder %s579_s17, 2  ;;  %s339_s18 = sand.u32 1, %s559_s12  }
  0xeb   : > { %s340_s19 = scalar_lea.sflag [#allocation3], %s339_s18 }
  0xec   : > { %p447_p1 = pnand %p450_p0, %p652_p8 }
  0xee   : > { %p448_p2 = pneg %p447_p1 }
  0xf0   : > { %554 = dma.done.wait (%p448_p2), %s340_s19, 128  }
  0xf1   : > { %556 = vsyncadd (%p448_p2), %s340_s19, 4294967168  ;;  %s16_s17 = sadd.s32 1, %s579_s17   ;;  %s722_s12 = smov %s563_s13 }
  0xf2   : > { %p13_p3 = scmp.ge.s32.totalorder %s16_s17, 4   ;;  %s723_s13 = smov %s567_s14 }
  0xf3   : > { %s724_s14 = smov %s658_s25  ;;  %s725_s15 = smov %s575_s16 }
  0xf4   : > { %s726_s16 = smov %s728_s20  ;;  %15 = sbr.rel (!%p13_p3) target bundleno = 4 (0x4), region = 73 }
  0xf9   :  { %345 = vsyncpa [#allocation3], 1 }
  0xfa   :  { %347 = vsyncpa [#allocation3 + $0x1], 1 }

</bundles_post_ra>
